<compile_context>
chip_gen: v7x
topology: tpu7x:2x2x1
jax: 0.10.0
libtpu: 0.0.40
codegen_flags: <defaults>
</compile_context>

<pallas_src>
import jax
import jax.numpy as jnp
from jax.experimental import pallas as pl
from jax.experimental.pallas import tpu as pltpu


def _round_up(x, m):
    return (x + m - 1) // m * m


# ------------------------------ Pallas kernel --------------------------------
def reranker_kernel(u_ref, it_ref, c_ref, s_ref,
                    w1u_ref, w1i_ref, w1c_ref, w1s_ref, b1_ref,
                    w2_ref, b2_ref, w3_ref, b3_ref, o_ref):
    f32 = jnp.float32

    # Layer 1: fused "concat + matmul" as per-source partial matmuls, all
    # accumulating in f32 (exact w.r.t. the single concatenated matmul up to
    # summation order).
    h1 = jnp.dot(u_ref[...], w1u_ref[...], preferred_element_type=f32)
    h1 = h1 + jnp.dot(it_ref[...], w1i_ref[...], preferred_element_type=f32)
    h1 = h1 + jnp.dot(c_ref[...], w1c_ref[...], preferred_element_type=f32)
    # Score column is a rank-1 update: cheap VPU outer product, skip the MXU.
    h1 = h1 + s_ref[...].astype(f32) * w1s_ref[...].astype(f32)
    h1 = jnp.maximum(h1 + b1_ref[...], 0.0)                      # f32 ReLU

    # Layer 2: [TB,128] @ [128,64], f32 accumulation, f32 bias/ReLU.
    h2 = jnp.dot(h1.astype(w2_ref.dtype), w2_ref[...],
                 preferred_element_type=f32)
    h2 = jnp.maximum(h2 + b2_ref[...], 0.0)

    # Output head (out_features=1): VPU multiply + lane reduction instead of a
    # wasteful N=1 MXU matmul; store lane-dense as a (1, TB) row.
    o = jnp.sum(h2 * w3_ref[...].astype(f32), axis=-1) + b3_ref[0, 0]
    o_ref[...] = o.reshape(1, -1).astype(o_ref.dtype)


# -------------------------------- wrapper -------------------------------------
def reranker_forward(user_feats, item_feats, context_feats, two_tower_score,
                     params, *, block_b=4096, compute_dtype=jnp.bfloat16):
    """Matches Reranker.forward; returns a float32 score vector of shape [B]."""
    B = user_feats.shape[0]
    Du = user_feats.shape[1]
    Di = item_feats.shape[1]
    Dc = context_feats.shape[1]
    in_dim = Du + Di + Dc + 1

    w1, b1 = params["w1"], params["b1"]
    w2, b2 = params["w2"], params["b2"]
    w3, b3 = params["w3"], params["b3"]
    assert w1.shape[0] == in_dim
    H1, H2 = w1.shape[1], w2.shape[1]

    # ----- batch tile selection (big tiles amortize ~0.35us/step overhead) ----
    b8 = _round_up(max(B, 1), 8)
    TB = min(_round_up(block_b, 8), b8)
    # v7x megacore: a large batch that fits a single tile would leave one
    # TensorCore idle -> split so the "parallel" grid axis has >= 2 steps.
    if b8 >= 2048 and TB >= b8:
        TB = _round_up(pl.cdiv(b8, 2), 8)
    Bp = _round_up(B, TB)
    n_tiles = Bp // TB

    # ----- streamed activations: no concat, no K padding, ragged tail only ----
    score_col = two_tower_score.reshape(B, 1)

    def prep(a):
        a = a.astype(compute_dtype)
        if Bp != B:
            a = jnp.pad(a, ((0, Bp - B), (0, 0)))
        return a

    u = prep(user_feats)
    it = prep(item_feats)
    c = prep(context_feats)
    s = prep(score_col)

    # ----- weights: W1 split row-wise to match the un-concatenated inputs -----
    w1 = w1.astype(compute_dtype)
    w1_u = w1[:Du]
    w1_i = w1[Du:Du + Di]
    w1_c = w1[Du + Di:Du + Di + Dc]
    w1_s = w1[Du + Di + Dc:]                                   # (1, H1)
    w2 = w2.astype(compute_dtype)
    w3_row = w3.reshape(1, H2).astype(compute_dtype)           # head as a row
    b1 = b1.reshape(1, H1).astype(jnp.float32)
    b2 = b2.reshape(1, H2).astype(jnp.float32)
    b3 = b3.reshape(1, 1).astype(jnp.float32)                  # scalar in SMEM

    act_bytes = jnp.dtype(compute_dtype).itemsize
    cost = pl.CostEstimate(
        flops=2 * Bp * (in_dim * H1 + H1 * H2 + H2),
        transcendentals=0,
        bytes_accessed=(Bp * in_dim * act_bytes                      # features
                        + (in_dim * H1 + H1 * H2 + H2) * act_bytes   # weights
                        + (H1 + H2 + 1) * 4                          # biases
                        + Bp * 4))                                   # output

    def row_spec(d):
        return pl.BlockSpec((TB, d), lambda i: (i, 0))

    def const_spec(shp):
        # Constant index_map -> DMA'd once, stays VMEM-resident across tiles.
        return pl.BlockSpec(shp, lambda i: (0, 0))

    out = pl.pallas_call(
        reranker_kernel,
        out_shape=jax.ShapeDtypeStruct((n_tiles, TB), jnp.float32),
        grid=(n_tiles,),
        in_specs=[
            row_spec(Du), row_spec(Di), row_spec(Dc), row_spec(1),
            const_spec((Du, H1)), const_spec((Di, H1)),
            const_spec((Dc, H1)), const_spec((1, H1)), const_spec((1, H1)),
            const_spec((H1, H2)), const_spec((1, H2)),
            const_spec((1, H2)),                                   # w3 row
            pl.BlockSpec(memory_space=pltpu.MemorySpace.SMEM),     # b3 scalar
        ],
        out_specs=pl.BlockSpec((1, TB), lambda i: (i, 0)),   # lane-dense store
        compiler_params=pltpu.CompilerParams(
            dimension_semantics=("parallel",),        # megacore sharding (v7x)
            vmem_limit_bytes=32 * 1024 * 1024),
        cost_estimate=cost,
    )(u, it, c, s, w1_u, w1_i, w1_c, w1_s, b1, w2, b2, w3_row, b3)

    # squeeze(-1): flatten the (n_tiles, TB) rows and drop the batch padding.
    return out.reshape(-1)[:B]


# ---------------------------- params / reference ------------------------------
def make_params(key, user_feat_dim, item_feat_dim, context_dim,
                hidden_dims=(128, 64)):
    in_dim = user_feat_dim + item_feat_dim + context_dim + 1
    ks = jax.random.split(key, 6)
    return {
        "w1": jax.random.normal(ks[0], (in_dim, hidden_dims[0]), jnp.float32) * 0.1,
        "b1": jax.random.normal(ks[1], (hidden_dims[0],), jnp.float32) * 0.1,
        "w2": jax.random.normal(ks[2], (hidden_dims[0], hidden_dims[1]), jnp.float32) * 0.1,
        "b2": jax.random.normal(ks[3], (hidden_dims[1],), jnp.float32) * 0.1,
        "w3": jax.random.normal(ks[4], (hidden_dims[1], 1), jnp.float32) * 0.1,
        "b3": jax.random.normal(ks[5], (1,), jnp.float32) * 0.1,
    }


def reference_forward(params, user_feats, item_feats, context_feats, score):
    x = jnp.concatenate(
        [user_feats, item_feats, context_feats, score[:, None]], axis=-1)
    h1 = jnp.maximum(x @ params["w1"] + params["b1"], 0.0)
    h2 = jnp.maximum(h1 @ params["w2"] + params["b2"], 0.0)
    return (h2 @ params["w3"] + params["b3"]).reshape(-1)


# ---------------------------------- demo ---------------------------------------
if __name__ == "__main__":
    key = jax.random.PRNGKey(0)
    ks = jax.random.split(key, 9)

    user_feat_dim, item_feat_dim, context_dim = 32, 32, 8
    hidden_dims = (128, 64)
    params = make_params(ks[0], user_feat_dim, item_feat_dim, context_dim,
                         hidden_dims)

    # --- small batch, single tile, exact f32 path -----------------------------
    B = 8
    u = jax.random.normal(ks[1], (B, user_feat_dim), jnp.float32)
    it = jax.random.normal(ks[2], (B, item_feat_dim), jnp.float32)
    c = jax.random.normal(ks[3], (B, context_dim), jnp.float32)
    s = jax.random.normal(ks[4], (B,), jnp.float32)

    out = reranker_forward(u, it, c, s, params, compute_dtype=jnp.float32)
    out = jax.block_until_ready(out)
    ref = reference_forward(params, u, it, c, s)
    assert out.shape == (B,)
    assert jnp.allclose(out, ref, atol=1e-4, rtol=1e-4)

    # --- larger ragged batch: multi-tile grid + zero-padded tail --------------
    B2 = 300
    u2 = jax.random.normal(ks[5], (B2, user_feat_dim), jnp.float32)
    i2 = jax.random.normal(ks[6], (B2, item_feat_dim), jnp.float32)
    c2 = jax.random.normal(ks[7], (B2, context_dim), jnp.float32)
    s2 = jax.random.normal(ks[8], (B2,), jnp.float32)

    out2 = reranker_forward(u2, i2, c2, s2, params, block_b=128,
                            compute_dtype=jnp.float32)          # grid=(3,)
    out2 = jax.block_until_ready(out2)
    ref2 = reference_forward(params, u2, i2, c2, s2)
    assert out2.shape == (B2,)
    assert jnp.allclose(out2, ref2, atol=1e-4, rtol=1e-4)

    # --- default bf16 streaming path (bandwidth-optimized) --------------------
    out_bf16 = reranker_forward(u2, i2, c2, s2, params, block_b=128)
    out_bf16 = jax.block_until_ready(out_bf16)
    assert bool(jnp.all(jnp.isfinite(out_bf16)))
    assert float(jnp.max(jnp.abs(out_bf16 - ref2))) < 0.1

    print("KERNEL_OK")
</pallas_src>

<mosaic_0001>
module attributes {stable_mosaic.version = 11 : i64} {
  func.func @reranker_kernel(%arg0: i32, %arg1: memref<8x32xf32, #tpu.memory_space<vmem>>, %arg2: memref<8x32xf32, #tpu.memory_space<vmem>>, %arg3: memref<8x8xf32, #tpu.memory_space<vmem>>, %arg4: memref<8x1xf32, #tpu.memory_space<vmem>>, %arg5: memref<32x128xf32, #tpu.memory_space<vmem>>, %arg6: memref<32x128xf32, #tpu.memory_space<vmem>>, %arg7: memref<8x128xf32, #tpu.memory_space<vmem>>, %arg8: memref<1x128xf32, #tpu.memory_space<vmem>>, %arg9: memref<1x128xf32, #tpu.memory_space<vmem>>, %arg10: memref<128x64xf32, #tpu.memory_space<vmem>>, %arg11: memref<1x64xf32, #tpu.memory_space<vmem>>, %arg12: memref<1x64xf32, #tpu.memory_space<vmem>>, %arg13: memref<1x1xf32, #tpu.memory_space<smem>>, %arg14: memref<1x8xf32, #tpu.memory_space<vmem>>) attributes {dimension_semantics = [#tpu.dimension_semantics<parallel>], iteration_bounds = array<i64: 1>, scalar_prefetch = 0 : i64, scratch_operands = 0 : i64, tpu.core_type = #tpu.core_type<tc>, window_params = [{transform_indices = @transform_0, window_bounds = array<i64: 8, 32>}, {transform_indices = @transform_1, window_bounds = array<i64: 8, 32>}, {transform_indices = @transform_2, window_bounds = array<i64: 8, 8>}, {transform_indices = @transform_3, window_bounds = array<i64: 8, 1>}, {pipeline_mode = #tpu.pipeline_mode<synchronous>, transform_indices = @transform_4, window_bounds = array<i64: 32, 128>}, {pipeline_mode = #tpu.pipeline_mode<synchronous>, transform_indices = @transform_5, window_bounds = array<i64: 32, 128>}, {pipeline_mode = #tpu.pipeline_mode<synchronous>, transform_indices = @transform_6, window_bounds = array<i64: 8, 128>}, {pipeline_mode = #tpu.pipeline_mode<synchronous>, transform_indices = @transform_7, window_bounds = array<i64: 1, 128>}, {pipeline_mode = #tpu.pipeline_mode<synchronous>, transform_indices = @transform_8, window_bounds = array<i64: 1, 128>}, {pipeline_mode = #tpu.pipeline_mode<synchronous>, transform_indices = @transform_9, window_bounds = array<i64: 128, 64>}, {pipeline_mode = #tpu.pipeline_mode<synchronous>, transform_indices = @transform_10, window_bounds = array<i64: 1, 64>}, {pipeline_mode = #tpu.pipeline_mode<synchronous>, transform_indices = @transform_11, window_bounds = array<i64: 1, 64>}, {transform_indices = @transform_12, window_bounds = array<i64: 1, 1>}, {transform_indices = @transform_13, window_bounds = array<i64: 1, 8>}]} {
    %c0 = arith.constant 0 : index
    %c0_0 = arith.constant 0 : index
    %0 = vector.load %arg1[%c0, %c0_0] : memref<8x32xf32, #tpu.memory_space<vmem>>, vector<8x32xf32>
    %c0_1 = arith.constant 0 : index
    %c0_2 = arith.constant 0 : index
    %1 = vector.load %arg5[%c0_1, %c0_2] : memref<32x128xf32, #tpu.memory_space<vmem>>, vector<32x128xf32>
    %cst = arith.constant dense<0.000000e+00> : vector<8x128xf32>
    %2 = tpu.matmul %0, %1, %cst {dimension_numbers = #tpu.dot_dimension_numbers<[1], [0], [0], [1], [0, 0, 1, 1], [], []>} : vector<8x32xf32>, vector<32x128xf32>, vector<8x128xf32> -> vector<8x128xf32>
    %c0_3 = arith.constant 0 : index
    %c0_4 = arith.constant 0 : index
    %3 = vector.load %arg2[%c0_3, %c0_4] : memref<8x32xf32, #tpu.memory_space<vmem>>, vector<8x32xf32>
    %c0_5 = arith.constant 0 : index
    %c0_6 = arith.constant 0 : index
    %4 = vector.load %arg6[%c0_5, %c0_6] : memref<32x128xf32, #tpu.memory_space<vmem>>, vector<32x128xf32>
    %cst_7 = arith.constant dense<0.000000e+00> : vector<8x128xf32>
    %5 = tpu.matmul %3, %4, %cst_7 {dimension_numbers = #tpu.dot_dimension_numbers<[1], [0], [0], [1], [0, 0, 1, 1], [], []>} : vector<8x32xf32>, vector<32x128xf32>, vector<8x128xf32> -> vector<8x128xf32>
    %6 = arith.addf %2, %5 : vector<8x128xf32>
    %c0_8 = arith.constant 0 : index
    %c0_9 = arith.constant 0 : index
    %7 = vector.load %arg3[%c0_8, %c0_9] : memref<8x8xf32, #tpu.memory_space<vmem>>, vector<8x8xf32>
    %c0_10 = arith.constant 0 : index
    %c0_11 = arith.constant 0 : index
    %8 = vector.load %arg7[%c0_10, %c0_11] : memref<8x128xf32, #tpu.memory_space<vmem>>, vector<8x128xf32>
    %cst_12 = arith.constant dense<0.000000e+00> : vector<8x128xf32>
    %9 = tpu.matmul %7, %8, %cst_12 {dimension_numbers = #tpu.dot_dimension_numbers<[1], [0], [0], [1], [0, 0, 1, 1], [], []>} : vector<8x8xf32>, vector<8x128xf32>, vector<8x128xf32> -> vector<8x128xf32>
    %10 = arith.addf %6, %9 : vector<8x128xf32>
    %c0_13 = arith.constant 0 : index
    %c0_14 = arith.constant 0 : index
    %11 = vector.load %arg4[%c0_13, %c0_14] : memref<8x1xf32, #tpu.memory_space<vmem>>, vector<8x1xf32>
    %c0_15 = arith.constant 0 : index
    %c0_16 = arith.constant 0 : index
    %12 = vector.load %arg8[%c0_15, %c0_16] : memref<1x128xf32, #tpu.memory_space<vmem>>, vector<1x128xf32>
    %13 = vector.broadcast %11 : vector<8x1xf32> to vector<8x128xf32>
    %14 = vector.broadcast %12 : vector<1x128xf32> to vector<8x128xf32>
    %15 = arith.mulf %13, %14 : vector<8x128xf32>
    %16 = arith.addf %10, %15 : vector<8x128xf32>
    %c0_17 = arith.constant 0 : index
    %c0_18 = arith.constant 0 : index
    %17 = vector.load %arg9[%c0_17, %c0_18] : memref<1x128xf32, #tpu.memory_space<vmem>>, vector<1x128xf32>
    %18 = vector.broadcast %17 : vector<1x128xf32> to vector<8x128xf32>
    %19 = arith.addf %16, %18 : vector<8x128xf32>
    %cst_19 = arith.constant 0.000000e+00 : f32
    %20 = vector.broadcast %cst_19 : f32 to vector<8x128xf32>
    %21 = arith.maximumf %19, %20 : vector<8x128xf32>
    %c0_20 = arith.constant 0 : index
    %c0_21 = arith.constant 0 : index
    %22 = vector.load %arg10[%c0_20, %c0_21] : memref<128x64xf32, #tpu.memory_space<vmem>>, vector<128x64xf32>
    %cst_22 = arith.constant dense<0.000000e+00> : vector<8x64xf32>
    %23 = tpu.matmul %21, %22, %cst_22 {dimension_numbers = #tpu.dot_dimension_numbers<[1], [0], [0], [1], [0, 0, 1, 1], [], []>} : vector<8x128xf32>, vector<128x64xf32>, vector<8x64xf32> -> vector<8x64xf32>
    %c0_23 = arith.constant 0 : index
    %c0_24 = arith.constant 0 : index
    %24 = vector.load %arg11[%c0_23, %c0_24] : memref<1x64xf32, #tpu.memory_space<vmem>>, vector<1x64xf32>
    %25 = vector.broadcast %24 : vector<1x64xf32> to vector<8x64xf32>
    %26 = arith.addf %23, %25 : vector<8x64xf32>
    %cst_25 = arith.constant 0.000000e+00 : f32
    %27 = vector.broadcast %cst_25 : f32 to vector<8x64xf32>
    %28 = arith.maximumf %26, %27 : vector<8x64xf32>
    %c0_26 = arith.constant 0 : index
    %c0_27 = arith.constant 0 : index
    %29 = vector.load %arg12[%c0_26, %c0_27] : memref<1x64xf32, #tpu.memory_space<vmem>>, vector<1x64xf32>
    %30 = vector.broadcast %29 : vector<1x64xf32> to vector<8x64xf32>
    %31 = arith.mulf %28, %30 : vector<8x64xf32>
    %cst_28 = arith.constant dense<0.000000e+00> : vector<8xf32>
    %32 = vector.multi_reduction <add>, %31, %cst_28 [1] : vector<8x64xf32> to vector<8xf32>
    %c0_29 = arith.constant 0 : index
    %c0_30 = arith.constant 0 : index
    %33 = memref.load %arg13[%c0_29, %c0_30] : memref<1x1xf32, #tpu.memory_space<smem>>
    %34 = vector.broadcast %33 : f32 to vector<8xf32>
    %35 = arith.addf %32, %34 : vector<8xf32>
    %36 = vector.shape_cast %35 : vector<8xf32> to vector<1x8xf32>
    %c0_31 = arith.constant 0 : index
    %c0_32 = arith.constant 0 : index
    %37 = vector.load %arg14[%c0_31, %c0_32] : memref<1x8xf32, #tpu.memory_space<vmem>>, vector<1x8xf32>
    tpu.vector_store %arg14[%c0_31, %c0_32], %36 {strides = array<i32>} : memref<1x8xf32, #tpu.memory_space<vmem>>, vector<1x8xf32>,
    return
  }
  func.func @transform_0(%arg0: i32) -> (i32, i32) {
    %c0_i32 = arith.constant 0 : i32
    %c0_i32_0 = arith.constant 0 : i32
    return %arg0, %c0_i32 : i32, i32
  }
  func.func @transform_1(%arg0: i32) -> (i32, i32) {
    %c0_i32 = arith.constant 0 : i32
    %c0_i32_0 = arith.constant 0 : i32
    return %arg0, %c0_i32 : i32, i32
  }
  func.func @transform_2(%arg0: i32) -> (i32, i32) {
    %c0_i32 = arith.constant 0 : i32
    %c0_i32_0 = arith.constant 0 : i32
    return %arg0, %c0_i32 : i32, i32
  }
  func.func @transform_3(%arg0: i32) -> (i32, i32) {
    %c0_i32 = arith.constant 0 : i32
    %c0_i32_0 = arith.constant 0 : i32
    return %arg0, %c0_i32 : i32, i32
  }
  func.func @transform_4(%arg0: i32) -> (i32, i32) {
    %c0_i32 = arith.constant 0 : i32
    %c0_i32_0 = arith.constant 0 : i32
    %c0_i32_1 = arith.constant 0 : i32
    return %c0_i32, %c0_i32_0 : i32, i32
  }
  func.func @transform_5(%arg0: i32) -> (i32, i32) {
    %c0_i32 = arith.constant 0 : i32
    %c0_i32_0 = arith.constant 0 : i32
    %c0_i32_1 = arith.constant 0 : i32
    return %c0_i32, %c0_i32_0 : i32, i32
  }
  func.func @transform_6(%arg0: i32) -> (i32, i32) {
    %c0_i32 = arith.constant 0 : i32
    %c0_i32_0 = arith.constant 0 : i32
    %c0_i32_1 = arith.constant 0 : i32
    return %c0_i32, %c0_i32_0 : i32, i32
  }
  func.func @transform_7(%arg0: i32) -> (i32, i32) {
    %c0_i32 = arith.constant 0 : i32
    %c0_i32_0 = arith.constant 0 : i32
    %c0_i32_1 = arith.constant 0 : i32
    return %c0_i32, %c0_i32_0 : i32, i32
  }
  func.func @transform_8(%arg0: i32) -> (i32, i32) {
    %c0_i32 = arith.constant 0 : i32
    %c0_i32_0 = arith.constant 0 : i32
    %c0_i32_1 = arith.constant 0 : i32
    return %c0_i32, %c0_i32_0 : i32, i32
  }
  func.func @transform_9(%arg0: i32) -> (i32, i32) {
    %c0_i32 = arith.constant 0 : i32
    %c0_i32_0 = arith.constant 0 : i32
    %c0_i32_1 = arith.constant 0 : i32
    return %c0_i32, %c0_i32_0 : i32, i32
  }
  func.func @transform_10(%arg0: i32) -> (i32, i32) {
    %c0_i32 = arith.constant 0 : i32
    %c0_i32_0 = arith.constant 0 : i32
    %c0_i32_1 = arith.constant 0 : i32
    return %c0_i32, %c0_i32_0 : i32, i32
  }
  func.func @transform_11(%arg0: i32) -> (i32, i32) {
    %c0_i32 = arith.constant 0 : i32
    %c0_i32_0 = arith.constant 0 : i32
    %c0_i32_1 = arith.constant 0 : i32
    return %c0_i32, %c0_i32_0 : i32, i32
  }
  func.func @transform_12(%arg0: i32) -> (i32, i32) {
    %c0_i32 = arith.constant 0 : i32
    %c0_i32_0 = arith.constant 0 : i32
    %c0_i32_1 = arith.constant 0 : i32
    return %c0_i32, %c0_i32_0 : i32, i32
  }
  func.func @transform_13(%arg0: i32) -> (i32, i32) {
    %c0_i32 = arith.constant 0 : i32
    %c0_i32_0 = arith.constant 0 : i32
    return %arg0, %c0_i32 : i32, i32
  }
}

</mosaic_0001>

<bundles_post_ra>
// kernel: tpu_custom_call.1
= control target key start
LH: loop header
LB: loop body
LE: loop exit
PB: predicated region body
PF: predicated region fallthrough
CT: control target
= control target key end

     0   :  { %v601_v3 = vmov 0.0|0.0   ;;  %vm602_vm0 = vmmov 0   ;;  %v603_v6 = vmov 0.0   ;;  %v604_v7 = vmov 0   ;;  %s808_s0 = inlined_call_operand.vmem [shape: f32[8,32], index: 0, kind: input, shape index: {}]   ;;  %s809_s1 = inlined_call_operand.vmem [shape: f32[8,32], index: 1, kind: input, shape index: {}]   ;;  %s810_s2 = inlined_call_operand.vmem [shape: f32[8,8], index: 2, kind: input, shape index: {}]   ;;  %s811_s3 = inlined_call_operand.vmem [shape: f32[8,1], index: 3, kind: input, shape index: {}]   ;;  %s812_s4 = inlined_call_operand.vmem [shape: f32[32,128], index: 4, kind: input, shape index: {}]   ;;  %s813_s5 = inlined_call_operand.vmem [shape: f32[32,128], index: 5, kind: input, shape index: {}]   ;;  %s814_s6 = inlined_call_operand.vmem [shape: f32[8,128], index: 6, kind: input, shape index: {}]   ;;  %s815_s7 = inlined_call_operand.vmem [shape: f32[1,128], index: 7, kind: input, shape index: {}]   ;;  %s816_s8 = inlined_call_operand.vmem [shape: f32[1,128], index: 8, kind: input, shape index: {}]   ;;  %s817_s9 = inlined_call_operand.vmem [shape: f32[128,64], index: 9, kind: input, shape index: {}]   ;;  %s818_s10 = inlined_call_operand.vmem [shape: f32[1,64], index: 10, kind: input, shape index: {}]   ;;  %s819_s11 = inlined_call_operand.vmem [shape: f32[1,64], index: 11, kind: input, shape index: {}]   ;;  %s820_s12 = inlined_call_operand.<no memory space> [shape: f32[1,1], index: 12, kind: input, shape index: {}]   ;;  %s821_s13 = inlined_call_operand.hbm [shape: f32[1,8], index: 13, kind: output, shape index: {}]  }
   0x1   :  { %v52_v0 = vld [vmem:[%s813_s5] sm:$0xff]  ;;  %v53_v1 = vld [vmem:[%s813_s5 + $0x8] sm:$0xff]  ;;  %v54_v2 = vld [vmem:[%s813_s5 + $0x10] sm:$0xff]  ;;  %535 = vmatprep.subr.bf16.mxu0 %v601_v3  ;;  %481 = vmatprep.mubr.msk.f32.mxu0 %vm602_vm0, %v603_v6 }
   0x2   :  { %v536_v4 = vpack.c.bf16 %v53_v1, %v52_v0  ;;  %v55_v5 = vld [vmem:[%s813_s5 + $0x18] sm:$0xff]  ;;  %576 = vset.pattern.permute.xlu0 %v604_v7  ;;  %547 = vmatprep.subr.bf16.mxu1 %v601_v3  ;;  %v47_v9 = vld [vmem:[%s812_s4] sm:$0xff]  ;;  %v48_v10 = vld [vmem:[%s812_s4 + $0x8] sm:$0xff] }
   0x3   :  { %v539_v8 = vpack.c.bf16 %v55_v5, %v54_v2  ;;  %532 = vmatprep.mubr.msk.f32.mxu1 %vm602_vm0, %v603_v6  ;;  %v280_v11 = vld [vmem:[%s811_s3] sm:$0xff]  ;;  %v305_v13 = vld [vmem:[%s817_s9 + $0x8] sm:$0xff]  ;;  %v306_v15 = vld [vmem:[%s817_s9 + $0x10] sm:$0xff] }
   0x4   :  { %537 = vmatpush3.bf16.msra.mxu0 %v536_v4  ;;  %v304_v12 = vld [vmem:[%s817_s9] sm:$0xff]  ;;  %284 = vperm.xlu0 %576, %v280_v11   ;;  %v307_v16 = vld [vmem:[%s817_s9 + $0x18] sm:$0xff] }
   0x5   :  { %538 = vmatprep.subr.bf16.mxu0 %v601_v3  ;;  %v548_v14 = vpack.c.bf16 %v305_v13, %v304_v12 }
   0x6   :  { %19 = vsyncpa [#allocation4], 0  ;;  %v51_v17 = vld [vmem:[%s809_s1] sm:$0xff]  ;;  %vm56_vm1 = vcmask 261120   ;;  %v542_v18 = vpack.c.bf16 %v48_v10, %v47_v9  ;;  %v49_v19 = vld [vmem:[%s812_s4 + $0x10] sm:$0xff]  ;;  %v551_v21 = vpack.c.bf16 %v307_v16, %v306_v15  ;;  %vm205_vm2 = vcmask 64512  }
   0x7   :  { %549 = vmatpush3.bf16.msra.mxu1 %v548_v14  ;;  %v50_v20 = vld [vmem:[%s812_s4 + $0x18] sm:$0xff]  ;;  %v308_v22 = vld [vmem:[%s817_s9 + $0x20] sm:$0xff]  ;;  %v309_v23 = vld [vmem:[%s817_s9 + $0x28] sm:$0xff]  ;;  %vm406_vm3 = vcmask 523264   ;;  %vm421_vm4 = vcmask 57344  }
   0x8   :  { %540 = vmatpush3.bf16.msra.mxu0 %v539_v8  ;;  %550 = vmatprep.subr.bf16.mxu1 %v601_v3  ;;  %v545_v24 = vpack.c.bf16 %v50_v20, %v49_v19  ;;  %v554_v25 = vpack.c.bf16 %v309_v23, %v308_v22  ;;  %v46_v26 = vld [vmem:[%s808_s0] sm:$0xff]  ;;  %v310_v29 = vld [vmem:[%s817_s9 + $0x30] sm:$0xff]  ;;  %v311_v30 = vld [vmem:[%s817_s9 + $0x38] sm:$0xff] }
   0x9   :  { %541 = vmatprep.subr.bf16.mxu0 %v601_v3  ;;  %v204_v27 = vld [vmem:[%s814_s6] sm:$0xff]  ;;  %v557_v31 = vpack.c.bf16 %v311_v30, %v310_v29  ;;  %v313_v33 = vld [vmem:[%s817_s9 + $0x48] sm:$0xff]  ;;  %v314_v35 = vld [vmem:[%s817_s9 + $0x50] sm:$0xff] }
   0xa   :  { %v203_v28 = vld [vmem:[%s810_s2] sm:$0xff]  ;;  %v315_v36 = vld [vmem:[%s817_s9 + $0x58] sm:$0xff]  ;;  %v317_v39 = vld [vmem:[%s817_s9 + $0x68] sm:$0xff] }
   0xb   :  { %482 = vmatmul.mubr.msk.f32.vlgmr.msra.gmra.mrb[0].mxu0 %vm56_vm1, %v51_v17  ;;  %552 = vmatpush3.bf16.msra.mxu1 %v551_v21  ;;  %v312_v32 = vld [vmem:[%s817_s9 + $0x40] sm:$0xff]  ;;  %v563_v37 = vpack.c.bf16 %v315_v36, %v314_v35  ;;  %v318_v41 = vld [vmem:[%s817_s9 + $0x70] sm:$0xff]  ;;  %v319_v42 = vld [vmem:[%s817_s9 + $0x78] sm:$0xff] }
   0xc   :  { %543 = vmatpush3.bf16.msra.mxu0 %v542_v18  ;;  %492 = vmatprep.mubr.msk.f32.mxu0 %vm602_vm0, %v603_v6  ;;  %v560_v34 = vpack.c.bf16 %v313_v33, %v312_v32  ;;  %v316_v38 = vld [vmem:[%s817_s9 + $0x60] sm:$0xff]  ;;  %v569_v43 = vpack.c.bf16 %v319_v42, %v318_v41 }
   0xd   :  { %544 = vmatprep.subr.bf16.mxu0 %v601_v3  ;;  %553 = vmatprep.subr.bf16.mxu1 %v601_v3  ;;  %v566_v40 = vpack.c.bf16 %v317_v39, %v316_v38  ;;  %v440_v47 = vld [vmem:[%s815_s7] ss:$0 sm:$0xff] }
   0xe   :  { %v441_v55 = vld [vmem:[%s816_s8] ss:$0 sm:$0xff] }
   0xf   :  { %555 = vmatpush3.bf16.msra.mxu1 %v554_v25  ;;  %v442_v59 = vld [vmem:[%s818_s10] ss:$0 sm:$0xff]  ;;  %s605_s10 = smov [#allocation3]  }
  0x10   :  { %546 = vmatpush3.bf16.msra.mxu0 %v545_v24  ;;  %556 = vmatprep.subr.bf16.mxu1 %v601_v3  ;;  %v443_v63 = vld [vmem:[%s819_s11] ss:$0 sm:$0xff]  ;;  %s429_s6 = sshll.u32 %s605_s10, 4  ;;  %s430_s6 = int_to_ptr.vmem [resolvable:$true] %s429_s6 }
  0x11   :  { %495 = vmatprep.subr.mxu0 %v603_v6  ;;  %s577_s11 = scalar_lea.vmem %s430_s6, 16  ;;  %s581_s26 = scalar_lea.vmem %s430_s6, 32 }
  0x12   :  { %p578_p0 = scmp.ne.s32.totalorder %s430_s6, %s577_s11  ;;  %p582_p1 = scmp.lt.s32.totalorder %s430_s6, %s430_s6 }
  0x13   :  { %493 = vmatmul.mubr.msk.f32.vlgmr.msra.gmra.mrb[2].mxu0 %vm56_vm1, %v46_v26  ;;  %558 = vmatpush3.bf16.msra.mxu1 %v557_v31  ;;  %p583_p2 = scmp.lt.s32.totalorder %s581_s26, %s577_s11 }
  0x14   :  { %496 = vmatpush3.msra.mxu0 %v204_v27  ;;  %497 = vmatprep.mubr.msk.f32.mxu0 %vm602_vm0, %v603_v6  ;;  %v411_v6 = vstv %s820_s12 }
  0x15   :  { %559 = vmatprep.subr.bf16.mxu1 %v601_v3  ;;  %p584_p3 = por %p583_p2, %p582_p1 }
  0x17   :  { %498 = vmatmul.mubr.msk.f32.vlgmr.msra.gmra.mrb[4].mxu0 %vm205_vm2, %v203_v28  ;;  %561 = vmatpush3.bf16.msra.mxu1 %v560_v34  ;;  %p585_p4 = pnand %p584_p3, %p578_p0 }
  0x18   :  { %562 = vmatprep.subr.bf16.mxu1 %v601_v3 }
  0x1b   :  { %564 = vmatpush3.bf16.msra.mxu1 %v563_v37 }
  0x1c   :  { %565 = vmatprep.subr.bf16.mxu1 %v601_v3 }
  0x1f   :  { %567 = vmatpush3.bf16.msra.mxu1 %v566_v40 }
  0x20   :  { %568 = vmatprep.subr.bf16.mxu1 %v601_v3  ;;  %v414_v3 = vlaneseq }
  0x22   :  { %v415_v4 = vand.u32 127, %v414_v3  ;;  %v417_v5 = vshrl.u32 %v414_v3, 7 }
  0x23   :  { %570 = vmatpush3.bf16.msra.mxu1 %v569_v43 }
  0x24   :  { %v418_v7 = vsub.s32 %v415_v4, %v417_v5 }
  0x83   :  { %v285_v48 = vpop.permute.xlu0 %284 }
  0x84   :  { %v293_v51 = vmul.f32 %v440_v47, %v285_v48 }
  0xde   :  { %v126_v44 = vpop.f32.mrb[0].mxu0 }
  0xdf   :  { %v483_v45 = vpop.f32.mrb[1].mxu0 }
  0xe6   :  { %v199_v46 = vpop.f32.mrb[2].mxu0 }
  0xe7   :  { %v200_v49 = vadd.f32 %v199_v46, %v126_v44  ;;  %v494_v50 = vpop.f32.mrb[3].mxu0 }
  0xea   :  { %v275_v52 = vpop.f32.mrb[4].mxu0 }
  0xeb   :  { %v279_v53 = vadd.f32 %v275_v52, %v200_v49  ;;  %v499_v54 = vpop.f32.mrb[5].mxu0 }
  0xed   :  { %v294_v56 = vadd.f32 %v293_v51, %v279_v53 }
  0xef   :  { %v302_v57 = vadd.f32 %v441_v55, %v294_v56 }
  0xf1   :  { %v303_v58 = vmax.f32 %v302_v57, 0.0 }
  0xf3   :  { %533 = vmatmul.mubr.f32.vlgmr.msra.gmra.mrb[0].mxu1 %v303_v58 }
 0x1c6   :  { %v393_v60 = vpop.f32.mrb[0].mxu1 }
 0x1c7   :  { %v394_v61 = vadd.f32 %v442_v59, %v393_v60  ;;  %v534_v62 = vpop.f32.mrb[1].mxu1 }
 0x1c9   :  { %v397_v0 = vmax.f32 %v394_v61, 0.0 }
 0x1cb   :  { %v405_v1 = vmul.f32 %v443_v63, %v397_v0 }
 0x1cd   :  { %v407_v2 = vsel %vm406_vm3, %v405_v1, 0.0 }
 0x1ce   :  { %408 = vadd.xlane.f32.xlu0 %v407_v2 }
 0x25b   :  { %v409_v8 = vpop.xlane.xlu0 %408 }
 0x25c   :  { %v412_v9 = vadd.f32 %v411_v6, %v409_v8 }
 0x25e   :  { %v419_v10 = vrot.slane %v412_v9, %v418_v7 }
 0x260   :  { %422 = vst.msk [vmem:[#allocation3] sm:$0x1] %vm421_vm4, %v419_v10 }
 0x261   :  { %588 = shalt.err (!%p585_p4)
}
 0x262   :  { %s589_s12 = scalar_lea.hbm %s821_s13, 16 }
 0x263   :  { %p590_p5 = scmp.ne.s32.totalorder %s821_s13, %s589_s12  ;;  %p593_p6 = scmp.lt.u32.totalorder %s589_s12, %s821_s13 }
 0x265   :  { %p595_p7 = pnand %p593_p6, %p590_p5 }
 0x267   :  { %598 = shalt.err (!%p595_p7)
}
 0x268   :  { %432 = dma.vmem_to_hbm [thread:$0]  %s430_s6, 16, %s821_s13, [#allocation4]  }
 0x269   :  { %599 = dma.done.wait [#allocation4], 16  }
 0x26a   :  { %600 = vsyncadd [#allocation4], 4294967280 }
 0x26b   :  { %436 = vsyncpa [#allocation4], 1 }

</bundles_post_ra>
